<compile_context>
chip_gen: v5e
topology: v5e:2x2
jax: 0.10.0
libtpu: 0.0.40
codegen_flags: <defaults>
</compile_context>

<pallas_src>
import functools

import jax
import jax.numpy as jnp
from jax.experimental import pallas as pl
from jax.experimental.pallas import tpu as pltpu


# ---------------------------------------------------------------------------
# helpers
# ---------------------------------------------------------------------------
def _normalize_dim(dim, ndim):
    # torch-style dim normalization: valid range is [-(ndim+1), ndim]
    if not (-(ndim + 1) <= dim <= ndim):
        raise IndexError(
            f"Dimension out of range (expected to be in range of "
            f"[{-(ndim + 1)}, {ndim}], but got {dim})")
    if dim < 0:
        dim = dim + ndim + 1
    return dim


def _unsqueezed_shape(x, dim):
    dim = _normalize_dim(dim, x.ndim)
    return x.shape[:dim] + (1,) + x.shape[dim:]


# ---------------------------------------------------------------------------
# primary path: zero-copy via input/output aliasing
# ---------------------------------------------------------------------------
def _unsqueeze_alias_kernel(x_hbm, o_hbm):
    # The output buffer *is* the input buffer (input_output_aliases={0: 0});
    # the data is already in place, so there is nothing to do.
    del x_hbm, o_hbm


def unsqueeze(x, dim):
    """Pallas equivalent of torch.Tensor.unsqueeze(dim).

    Zero-copy: output aliases the input buffer.  For a true zero-HBM-traffic
    op, call under jax.jit with the input donated (donate_argnums).
    """
    out_shape = _unsqueezed_shape(x, dim)

    # Free, metadata-only insertion of the size-1 axis (identical element
    # order), so the aliased input/output shapes match exactly.
    x_view = jnp.reshape(x, out_shape)

    return pl.pallas_call(
        _unsqueeze_alias_kernel,
        out_shape=jax.ShapeDtypeStruct(out_shape, x.dtype),
        in_specs=[pl.BlockSpec(memory_space=pl.ANY)],
        out_specs=pl.BlockSpec(memory_space=pl.ANY),
        input_output_aliases={0: 0},
        cost_estimate=pl.CostEstimate(
            flops=0, transcendentals=0, bytes_accessed=0),
    )(x_view)


# ---------------------------------------------------------------------------
# fallback path: explicit HBM->HBM DMA copy (no donation required)
# ---------------------------------------------------------------------------
_CHUNK_THRESHOLD_BYTES = 128 * 1024 * 1024  # only chunk very large copies
_MAX_DMA_CHUNKS = 8


def _chunk_bounds(out_shape, itemsize):
    """Static (start, size) chunks along axis 0; single chunk for small x."""
    nbytes = itemsize
    for s in out_shape:
        nbytes *= s
    if not out_shape or out_shape[0] < 2 or nbytes < _CHUNK_THRESHOLD_BYTES:
        return ((0, out_shape[0] if out_shape else 1),)
    lead = out_shape[0]
    n = min(_MAX_DMA_CHUNKS, lead)
    base, rem = divmod(lead, n)
    bounds, lo = [], 0
    for i in range(n):
        sz = base + (1 if i < rem else 0)
        bounds.append((lo, sz))
        lo += sz
    return tuple(bounds)


def _unsqueeze_copy_kernel(x_hbm, o_hbm, sems, *, chunk_bounds):
    if len(chunk_bounds) == 1:
        # Single HBM->HBM DMA of the whole (already unit-dim-inserted) view.
        cp = pltpu.make_async_copy(x_hbm, o_hbm, sems.at[0])
        cp.start()
        cp.wait()
    else:
        # Multiple concurrent DMAs on separate semaphores (more DMA queues in
        # flight; helps saturate v7x HBM on very large copies).
        copies = []
        for i, (lo, sz) in enumerate(chunk_bounds):
            cp = pltpu.make_async_copy(
                x_hbm.at[pl.ds(lo, sz)], o_hbm.at[pl.ds(lo, sz)], sems.at[i])
            cp.start()
            copies.append(cp)
        for cp in copies:
            cp.wait()


def unsqueeze_copy(x, dim):
    """Unsqueeze that materializes a fresh output buffer (HBM->HBM DMA)."""
    out_shape = _unsqueezed_shape(x, dim)
    x_view = jnp.reshape(x, out_shape)

    bounds = _chunk_bounds(out_shape, x.dtype.itemsize)
    num_chunks = len(bounds)
    nbytes = x.size * x.dtype.itemsize

    kernel = functools.partial(_unsqueeze_copy_kernel, chunk_bounds=bounds)

    return pl.pallas_call(
        kernel,
        out_shape=jax.ShapeDtypeStruct(out_shape, x.dtype),
        # Keep both operands in HBM; the kernel drives the copy itself.
        in_specs=[pl.BlockSpec(memory_space=pl.ANY)],
        out_specs=pl.BlockSpec(memory_space=pl.ANY),
        scratch_shapes=[pltpu.SemaphoreType.DMA((num_chunks,))],
        cost_estimate=pl.CostEstimate(
            flops=0, transcendentals=0, bytes_accessed=2 * nbytes),
    )(x_view)


if __name__ == "__main__":
    key = jax.random.PRNGKey(0)
    # NCHW input, matching a typical PyTorch conv-style tensor.
    x = jax.random.normal(key, (2, 4, 16, 16), dtype=jnp.float32)

    # --- zero-copy aliased path ------------------------------------------
    y = jax.block_until_ready(unsqueeze(x, 1))
    assert y.shape == (2, 1, 4, 16, 16), y.shape
    assert y.dtype == x.dtype
    assert jnp.array_equal(y, jnp.expand_dims(x, 1))

    y2 = jax.block_until_ready(unsqueeze(x, -1))
    assert y2.shape == (2, 4, 16, 16, 1), y2.shape
    assert jnp.array_equal(y2, jnp.expand_dims(x, -1))

    y3 = jax.block_until_ready(unsqueeze(x, 0))
    assert y3.shape == (1, 2, 4, 16, 16), y3.shape
    assert jnp.array_equal(y3, jnp.expand_dims(x, 0))

    # --- aliased path with real buffer donation (true zero-copy) ----------
    x_don = jax.random.normal(jax.random.PRNGKey(0), (2, 4, 16, 16),
                              dtype=jnp.float32)
    ref_don = jnp.expand_dims(x_don, 2)
    unsq_jit = jax.jit(functools.partial(unsqueeze, dim=2), donate_argnums=0)
    y_don = jax.block_until_ready(unsq_jit(x_don))
    assert y_don.shape == (2, 4, 1, 16, 16), y_don.shape
    assert jnp.array_equal(y_don, ref_don)

    # --- explicit-copy fallback path (no donation possible) ---------------
    yc = jax.block_until_ready(unsqueeze_copy(x, 1))
    assert yc.shape == (2, 1, 4, 16, 16), yc.shape
    assert jnp.array_equal(yc, jnp.expand_dims(x, 1))

    yc2 = jax.block_until_ready(unsqueeze_copy(x, -1))
    assert yc2.shape == (2, 4, 16, 16, 1), yc2.shape
    assert jnp.array_equal(yc2, jnp.expand_dims(x, -1))

    print("KERNEL_OK")
</pallas_src>

<mosaic_0001>
module attributes {stable_mosaic.version = 11 : i64} {
  func.func @_unsqueeze_alias_kernel(%arg0: memref<2x1x4x16x16xf32, #tpu.memory_space<any>>, %arg1: memref<2x1x4x16x16xf32, #tpu.memory_space<any>>) attributes {dimension_semantics = [], scalar_prefetch = 0 : i64, scratch_operands = 0 : i64, tpu.core_type = #tpu.core_type<tc>} {
    return
  }
}

</mosaic_0001>

<bundles_post_ra>
// kernel: tpu_custom_call.1
= control target key start
LH: loop header
LB: loop body
LE: loop exit
PB: predicated region body
PF: predicated region fallthrough
CT: control target
= control target key end

     0   :  { %s16_s0 = inlined_call_operand.hbm [shape: f32[2,1,4,16,16], index: 0, kind: input, shape index: {}, may-alias: {0,1}]   ;;  %s17_s1 = inlined_call_operand.hbm [shape: f32[2,1,4,16,16], index: 1, kind: output, shape index: {}, may-alias: {0,1}]  }

</bundles_post_ra>
